<compile_context>
chip_gen: v7x
topology: tpu7x:2x2x1
jax: 0.10.0
libtpu: 0.0.40
codegen_flags: <defaults>
</compile_context>

<pallas_src>
import jax
import jax.numpy as jnp
from jax.experimental import pallas as pl
from jax.experimental.pallas import tpu as pltpu


_LANES = 512          # lane-dense block width (multiple of 128)
_MAX_ROW_BLOCK = 512  # sublane tile (multiple of 8): 512x512 f32 = 1 MiB / buffer


def _round_up(n, m):
    return ((n + m - 1) // m) * m


def _hsilu_kernel(x_ref, o_ref):
    # HSiLU / hardswish: x * clip(x + 3, 0, 6) / 6
    # Math in f32 (v5e VPU has no bf16); store back in the original dtype.
    x = x_ref[...].astype(jnp.float32)
    y = x * (jnp.clip(x + 3.0, 0.0, 6.0) * (1.0 / 6.0))
    o_ref[...] = y.astype(o_ref.dtype)


@jax.jit
def hsilu(x):
    """Elementwise x * hardsigmoid(x) for any shape/dtype via a tiled Pallas kernel."""
    orig_shape = x.shape
    n = x.size
    flat = x.reshape(-1)

    # Flatten to a lane-dense (rows, lanes) slab; pad with zeros (hsilu(0) == 0).
    lanes = _LANES if n >= _LANES else 128
    nrows = max(1, -(-n // lanes))                       # cdiv
    row_block = min(_MAX_ROW_BLOCK, _round_up(nrows, 8))
    nrows_p = _round_up(nrows, row_block)
    pad = nrows_p * lanes - n
    xp = jnp.pad(flat, (0, pad)).reshape(nrows_p, lanes)

    grid = (nrows_p // row_block,)
    out = pl.pallas_call(
        _hsilu_kernel,
        out_shape=jax.ShapeDtypeStruct((nrows_p, lanes), x.dtype),
        grid=grid,
        in_specs=[pl.BlockSpec((row_block, lanes), lambda i: (i, 0))],
        out_specs=pl.BlockSpec((row_block, lanes), lambda i: (i, 0)),
        compiler_params=pltpu.CompilerParams(
            dimension_semantics=("parallel",),           # 2-TC sharding on v7x
            vmem_limit_bytes=32 * 1024 * 1024,           # safe on v5e/v6e/v7x
        ),
    )(xp)
    return out.reshape(-1)[:n].reshape(orig_shape)


def _hsilu_ref(x):
    # PyTorch: x * hardsigmoid(x), hardsigmoid(x) = clip(x / 6 + 1/2, 0, 1)
    xf = x.astype(jnp.float32)
    return (xf * jnp.clip(xf / 6.0 + 0.5, 0.0, 1.0)).astype(x.dtype)


if __name__ == "__main__":
    key = jax.random.PRNGKey(0)

    # small shape consistent with the module: batch=2, channels=4, spatial=16
    x = jax.random.normal(key, (2, 4, 16, 16), jnp.float32) * 4.0
    y = jax.block_until_ready(hsilu(x))
    assert y.shape == x.shape and y.dtype == x.dtype
    assert jnp.allclose(y, _hsilu_ref(x), atol=1e-5, rtol=1e-5)

    # odd, non-tile-aligned shape (exercises the padding path)
    x2 = jax.random.normal(jax.random.fold_in(key, 1), (3, 5, 7, 11), jnp.float32) * 4.0
    y2 = jax.block_until_ready(hsilu(x2))
    assert jnp.allclose(y2, _hsilu_ref(x2), atol=1e-5, rtol=1e-5)

    # bf16 storage path (halves HBM traffic; math still f32 inside the kernel)
    xb = x.astype(jnp.bfloat16)
    yb = jax.block_until_ready(hsilu(xb))
    assert yb.dtype == jnp.bfloat16
    assert jnp.allclose(yb.astype(jnp.float32), _hsilu_ref(xb).astype(jnp.float32),
                        atol=2e-2, rtol=2e-2)

    assert bool(jnp.all(jnp.isfinite(y))) and bool(jnp.all(jnp.isfinite(y2)))
    print("KERNEL_OK")
</pallas_src>

<mosaic_0001>
module attributes {stable_mosaic.version = 11 : i64} {
  func.func @_hsilu_kernel(%arg0: i32, %arg1: memref<8x512xf32, #tpu.memory_space<vmem>>, %arg2: memref<8x512xf32, #tpu.memory_space<vmem>>) attributes {dimension_semantics = [#tpu.dimension_semantics<parallel>], iteration_bounds = array<i64: 1>, scalar_prefetch = 0 : i64, scratch_operands = 0 : i64, tpu.core_type = #tpu.core_type<tc>, window_params = [{transform_indices = @transform_0, window_bounds = array<i64: 8, 512>}, {transform_indices = @transform_1, window_bounds = array<i64: 8, 512>}]} {
    %c0 = arith.constant 0 : index
    %c0_0 = arith.constant 0 : index
    %0 = vector.load %arg1[%c0, %c0_0] : memref<8x512xf32, #tpu.memory_space<vmem>>, vector<8x512xf32>
    %cst = arith.constant 3.000000e+00 : f32
    %1 = vector.broadcast %cst : f32 to vector<8x512xf32>
    %2 = arith.addf %0, %1 : vector<8x512xf32>
    %cst_1 = arith.constant 0.000000e+00 : f32
    %cst_2 = arith.constant 6.000000e+00 : f32
    %3 = vector.broadcast %cst_1 : f32 to vector<8x512xf32>
    %4 = arith.maximumf %3, %2 : vector<8x512xf32>
    %5 = vector.broadcast %cst_2 : f32 to vector<8x512xf32>
    %6 = arith.minimumf %5, %4 : vector<8x512xf32>
    %cst_3 = arith.constant 0.166666672 : f32
    %7 = vector.broadcast %cst_3 : f32 to vector<8x512xf32>
    %8 = arith.mulf %6, %7 : vector<8x512xf32>
    %9 = arith.mulf %0, %8 : vector<8x512xf32>
    %c0_4 = arith.constant 0 : index
    %c0_5 = arith.constant 0 : index
    %10 = vector.load %arg2[%c0_4, %c0_5] : memref<8x512xf32, #tpu.memory_space<vmem>>, vector<8x512xf32>
    tpu.vector_store %arg2[%c0_4, %c0_5], %9 {strides = array<i32>} : memref<8x512xf32, #tpu.memory_space<vmem>>, vector<8x512xf32>,
    return
  }
  func.func @transform_0(%arg0: i32) -> (i32, i32) {
    %c0_i32 = arith.constant 0 : i32
    %c0_i32_0 = arith.constant 0 : i32
    return %arg0, %c0_i32 : i32, i32
  }
  func.func @transform_1(%arg0: i32) -> (i32, i32) {
    %c0_i32 = arith.constant 0 : i32
    %c0_i32_0 = arith.constant 0 : i32
    return %arg0, %c0_i32 : i32, i32
  }
}

</mosaic_0001>

<bundles_post_ra>
// kernel: hsilu.1
= control target key start
LH: loop header
LB: loop body
LE: loop exit
PB: predicated region body
PF: predicated region fallthrough
CT: control target
= control target key end

     0   :  { %s74_s0 = inlined_call_operand.vmem [shape: f32[8,512], index: 0, kind: input, shape index: {}]   ;;  %s75_s1 = inlined_call_operand.vmem [shape: f32[8,512], index: 1, kind: output, shape index: {}]  }
   0x1   :  { %v8_v0 = vld [vmem:[%s74_s0] sm:$0xff]  ;;  %v9_v1 = vld [vmem:[%s74_s0 + $0x8] sm:$0xff]  ;;  %v10_v2 = vld [vmem:[%s74_s0 + $0x10] sm:$0xff] }
   0x2   :  { %v12_v3 = vadd.f32 3.0, %v8_v0  ;;  %v13_v4 = vadd.f32 3.0, %v9_v1  ;;  %v14_v5 = vadd.f32 3.0, %v10_v2  ;;  %v11_v6 = vld [vmem:[%s74_s0 + $0x18] sm:$0xff] }
   0x3   :  { %v15_v7 = vadd.f32 3.0, %v11_v6 }
   0x4   :  { %v16_v8 = vmax.f32 %v12_v3, 0.0  ;;  %v17_v9 = vmax.f32 %v13_v4, 0.0  ;;  %v18_v10 = vmax.f32 %v14_v5, 0.0 }
   0x5   :  { %v19_v11 = vmax.f32 %v15_v7, 0.0 }
   0x6   :  { %v20_v12 = vmin.f32 %v16_v8, 6.0  ;;  %v21_v13 = vmin.f32 %v17_v9, 6.0  ;;  %v22_v14 = vmin.f32 %v18_v10, 6.0 }
   0x7   :  { %v23_v15 = vmin.f32 %v19_v11, 6.0 }
   0x8   :  { %v24_v16 = vmul.f32 0.16666667, %v20_v12  ;;  %v25_v17 = vmul.f32 0.16666667, %v21_v13  ;;  %v26_v18 = vmul.f32 0.16666667, %v22_v14 }
   0x9   :  { %v27_v19 = vmul.f32 0.16666667, %v23_v15 }
   0xa   :  { %v28_v20 = vmul.f32 %v24_v16, %v8_v0  ;;  %v29_v21 = vmul.f32 %v25_v17, %v9_v1  ;;  %v30_v22 = vmul.f32 %v26_v18, %v10_v2 }
   0xb   :  { %v31_v23 = vmul.f32 %v27_v19, %v11_v6 }
   0xc   :  { %32 = vst [vmem:[%s75_s1] sm:$0xff] %v28_v20  ;;  %33 = vst [vmem:[%s75_s1 + $0x8] sm:$0xff] %v29_v21 }
   0xd   :  { %34 = vst [vmem:[%s75_s1 + $0x10] sm:$0xff] %v30_v22  ;;  %35 = vst [vmem:[%s75_s1 + $0x18] sm:$0xff] %v31_v23 }

</bundles_post_ra>
